<compile_context>
chip_gen: v6e
topology: v6e:2x2x1
jax: 0.10.0
libtpu: 0.0.40
codegen_flags: <defaults>
</compile_context>

<pallas_src>
import functools

import jax
import jax.numpy as jnp
from jax.experimental import pallas as pl
from jax.experimental.pallas import tpu as pltpu


def _round_up(x, m):
    return ((x + m - 1) // m) * m


def _noisy_topk_router_kernel(top_k, num_experts,
                              x_ref, w_ref, b_ref, noise_ref,
                              out_ref, idx_ref):
    E = num_experts

    # Single fused projection: (tm, D) @ (D, 2E) + (1, 2E)
    fused = jnp.dot(x_ref[...], w_ref[...],
                    preferred_element_type=jnp.float32) + b_ref[...]
    logits = fused[:, :E]            # route logits
    noise_logits = fused[:, E:]      # noise logits

    # Numerically stable softplus (matches F.softplus up to its linear-above-20
    # threshold, a negligible documented difference).
    sp = jnp.maximum(noise_logits, 0.0) + jnp.log(1.0 + jnp.exp(-jnp.abs(noise_logits)))

    noisy = logits + noise_ref[...] * sp                        # (tm, E)

    tm = noisy.shape[0]
    lane_iota = jax.lax.broadcasted_iota(jnp.int32, (tm, E), 1)
    k_iota = jax.lax.broadcasted_iota(jnp.int32, (tm, top_k), 1)

    # Iterative top-k: take the row max (first occurrence on ties), record its
    # index, mask it out.  Exact value/index semantics of torch.topk kept.
    work = noisy
    topk_mask = jnp.zeros((tm, E), dtype=jnp.bool_)
    idx_out = jnp.zeros((tm, top_k), dtype=jnp.int32)
    row_max = None
    for k in range(top_k):
        m = jnp.max(work, axis=-1, keepdims=True)                           # (tm, 1)
        if k == 0:
            row_max = m   # top-1 max == max over the top-k support -> reuse for softmax
        eq = work == m
        idx = jnp.min(jnp.where(eq, lane_iota, E), axis=-1, keepdims=True)  # (tm, 1)
        sel = lane_iota == idx                                              # one-hot
        topk_mask = jnp.logical_or(topk_mask, sel)
        idx_out = jnp.where(k_iota == k, idx, idx_out)                      # place col k
        work = jnp.where(sel, -jnp.inf, work)

    # sparse_logits: -inf everywhere except top-k positions, then softmax.
    # All exp arguments are <= 0 (shifted by the row max), masked positions are
    # forced to exactly 0.  Exact division keeps row sums == 1 to f32 rounding.
    e = jnp.where(topk_mask, jnp.exp(noisy - row_max), 0.0)
    denom = jnp.sum(e, axis=-1, keepdims=True)
    probs = e / denom

    out_ref[...] = probs.astype(out_ref.dtype)
    idx_ref[...] = idx_out


def noisy_topk_router(x, w_route, b_route, w_noise, b_noise, noise, *, top_k, tm=512):
    """x: (N, D) float32.  weights: (D, E).  biases: (1, E).  noise: (N, E)."""
    N, D = x.shape
    E = w_route.shape[1]

    # Fuse the two linear layers into one (D, 2E) weight / (1, 2E) bias.
    w_fused = jnp.concatenate([w_route, w_noise], axis=1)
    b_fused = jnp.concatenate([b_route, b_noise], axis=1)

    # Tile selection: as big as possible, but cap so the double-buffered f32
    # x tile (2 * tm * D * 4 B) stays comfortably inside the scoped VMEM limit.
    vmem_budget = 16 * 1024 * 1024
    tm_cap = max(8, (vmem_budget // (2 * D * 4)) // 8 * 8)
    tm = max(8, min(tm, tm_cap, _round_up(N, 8)))

    Np = _round_up(N, tm)
    if Np != N:
        x = jnp.pad(x, ((0, Np - N), (0, 0)))
        noise = jnp.pad(noise, ((0, Np - N), (0, 0)))

    grid = (Np // tm,)
    kernel = functools.partial(_noisy_topk_router_kernel, top_k, E)

    out, idx = pl.pallas_call(
        kernel,
        out_shape=(
            jax.ShapeDtypeStruct((Np, E), jnp.float32),
            jax.ShapeDtypeStruct((Np, top_k), jnp.int32),
        ),
        grid_spec=pltpu.PrefetchScalarGridSpec(
            num_scalar_prefetch=0,
            grid=grid,
            in_specs=[
                pl.BlockSpec((tm, D), lambda i: (i, 0)),       # x tile
                pl.BlockSpec((D, 2 * E), lambda i: (0, 0)),    # fused weight (resident)
                pl.BlockSpec((1, 2 * E), lambda i: (0, 0)),    # fused bias (resident)
                pl.BlockSpec((tm, E), lambda i: (i, 0)),       # gaussian noise
            ],
            out_specs=[
                pl.BlockSpec((tm, E), lambda i: (i, 0)),       # router_output
                pl.BlockSpec((tm, top_k), lambda i: (i, 0)),   # indices
            ],
        ),
        compiler_params=pltpu.CompilerParams(
            dimension_semantics=("parallel",),
            vmem_limit_bytes=32 * 1024 * 1024,
        ),
    )(x, w_fused, b_fused, noise)

    if Np != N:
        out = out[:N]
        idx = idx[:N]
    return out, idx


if __name__ == "__main__":
    # Small shapes consistent with the module: (batch, seq, d_model) tokens.
    batch, seq, d_model = 2, 8, 32
    num_experts, top_k = 8, 2

    key = jax.random.PRNGKey(0)
    k_x, k_wr, k_br, k_wn, k_bn, k_noise = jax.random.split(key, 6)

    # Deterministic nn.Linear-style init: uniform(-1/sqrt(D), 1/sqrt(D)).
    bound = 1.0 / (d_model ** 0.5)
    w_route = jax.random.uniform(k_wr, (d_model, num_experts), jnp.float32, -bound, bound)
    b_route = jax.random.uniform(k_br, (1, num_experts), jnp.float32, -bound, bound)
    w_noise = jax.random.uniform(k_wn, (d_model, num_experts), jnp.float32, -bound, bound)
    b_noise = jax.random.uniform(k_bn, (1, num_experts), jnp.float32, -bound, bound)

    x = jax.random.normal(k_x, (batch, seq, d_model), jnp.float32)
    x_flat = x.reshape(batch * seq, d_model)
    gauss = jax.random.normal(k_noise, (batch * seq, num_experts), jnp.float32)

    router_out_flat, indices_flat = noisy_topk_router(
        x_flat, w_route, b_route, w_noise, b_noise, gauss, top_k=top_k)

    router_output = router_out_flat.reshape(batch, seq, num_experts)
    indices = indices_flat.reshape(batch, seq, top_k)
    jax.block_until_ready((router_output, indices))

    # --- Checks ---
    # 1) softmax rows sum to 1 (exact division in-kernel).
    row_sums = jnp.sum(router_output, axis=-1)
    assert bool(jnp.all(jnp.abs(row_sums - 1.0) < 1e-4)), "softmax rows must sum to 1"

    # 2) indices valid and distinct per row.
    assert bool(jnp.all((indices >= 0) & (indices < num_experts))), "indices out of range"
    assert bool(jnp.all(indices[..., 0] != indices[..., 1])), "duplicate top-k indices"

    # 3) all probability mass lives exactly on the returned top-k indices.
    gathered = jnp.take_along_axis(router_out_flat, indices_flat, axis=-1)
    assert bool(jnp.all(gathered > 0.0)), "top-k positions must have positive prob"
    assert bool(jnp.all(jnp.abs(jnp.sum(gathered, axis=-1) - 1.0) < 1e-4)), \
        "mass must be concentrated on the top-k indices"

    # 4) matches a pure-JAX reference of the PyTorch forward (same noise draw).
    hp = jax.lax.Precision.HIGHEST
    logits_ref = jnp.dot(x_flat, w_route, precision=hp) + b_route
    noise_logits_ref = jnp.dot(x_flat, w_noise, precision=hp) + b_noise
    noisy_ref = logits_ref + gauss * jax.nn.softplus(noise_logits_ref)
    topv, topi = jax.lax.top_k(noisy_ref, top_k)
    rows = jnp.arange(x_flat.shape[0])[:, None]
    sparse_ref = jnp.full_like(noisy_ref, -jnp.inf).at[rows, topi].set(topv)
    ref_out = jax.nn.softmax(sparse_ref, axis=-1)
    assert bool(jnp.allclose(router_out_flat, ref_out, atol=1e-3)), "mismatch vs reference"

    print("KERNEL_OK")
</pallas_src>

<mosaic_0001>
module attributes {stable_mosaic.version = 11 : i64} {
  func.func @_noisy_topk_router_kernel(%arg0: i32, %arg1: memref<16x32xf32, #tpu.memory_space<vmem>>, %arg2: memref<32x16xf32, #tpu.memory_space<vmem>>, %arg3: memref<1x16xf32, #tpu.memory_space<vmem>>, %arg4: memref<16x8xf32, #tpu.memory_space<vmem>>, %arg5: memref<16x8xf32, #tpu.memory_space<vmem>>, %arg6: memref<16x2xi32, #tpu.memory_space<vmem>>) attributes {dimension_semantics = [#tpu.dimension_semantics<parallel>], iteration_bounds = array<i64: 1>, scalar_prefetch = 0 : i64, scratch_operands = 0 : i64, tpu.core_type = #tpu.core_type<tc>, window_params = [{transform_indices = @transform_0, window_bounds = array<i64: 16, 32>}, {pipeline_mode = #tpu.pipeline_mode<synchronous>, transform_indices = @transform_1, window_bounds = array<i64: 32, 16>}, {pipeline_mode = #tpu.pipeline_mode<synchronous>, transform_indices = @transform_2, window_bounds = array<i64: 1, 16>}, {transform_indices = @transform_3, window_bounds = array<i64: 16, 8>}, {transform_indices = @transform_4, window_bounds = array<i64: 16, 8>}, {transform_indices = @transform_5, window_bounds = array<i64: 16, 2>}]} {
    %c0 = arith.constant 0 : index
    %c0_0 = arith.constant 0 : index
    %0 = vector.load %arg1[%c0, %c0_0] : memref<16x32xf32, #tpu.memory_space<vmem>>, vector<16x32xf32>
    %c0_1 = arith.constant 0 : index
    %c0_2 = arith.constant 0 : index
    %1 = vector.load %arg2[%c0_1, %c0_2] : memref<32x16xf32, #tpu.memory_space<vmem>>, vector<32x16xf32>
    %cst = arith.constant dense<0.000000e+00> : vector<16x16xf32>
    %2 = tpu.matmul %0, %1, %cst {dimension_numbers = #tpu.dot_dimension_numbers<[1], [0], [0], [1], [0, 0, 1, 1], [], []>} : vector<16x32xf32>, vector<32x16xf32>, vector<16x16xf32> -> vector<16x16xf32>
    %c0_3 = arith.constant 0 : index
    %c0_4 = arith.constant 0 : index
    %3 = vector.load %arg3[%c0_3, %c0_4] : memref<1x16xf32, #tpu.memory_space<vmem>>, vector<1x16xf32>
    %4 = vector.broadcast %3 : vector<1x16xf32> to vector<16x16xf32>
    %5 = arith.addf %2, %4 : vector<16x16xf32>
    %6 = vector.extract_strided_slice %5 {offsets = [0, 0], sizes = [16, 8], strides = [1, 1]} : vector<16x16xf32> to vector<16x8xf32>
    %7 = vector.extract_strided_slice %5 {offsets = [0, 8], sizes = [16, 8], strides = [1, 1]} : vector<16x16xf32> to vector<16x8xf32>
    %cst_5 = arith.constant 0.000000e+00 : f32
    %8 = vector.broadcast %cst_5 : f32 to vector<16x8xf32>
    %9 = arith.maximumf %7, %8 : vector<16x8xf32>
    %10 = math.absf %7 : vector<16x8xf32>
    %cst_6 = arith.constant 0.000000e+00 : f32
    %11 = vector.broadcast %cst_6 : f32 to vector<16x8xf32>
    %12 = arith.subf %11, %10 : vector<16x8xf32>
    %13 = math.exp %12 : vector<16x8xf32>
    %cst_7 = arith.constant 1.000000e+00 : f32
    %14 = vector.broadcast %cst_7 : f32 to vector<16x8xf32>
    %15 = arith.addf %14, %13 : vector<16x8xf32>
    %16 = math.log %15 : vector<16x8xf32>
    %17 = arith.addf %9, %16 : vector<16x8xf32>
    %c0_8 = arith.constant 0 : index
    %c0_9 = arith.constant 0 : index
    %18 = vector.load %arg4[%c0_8, %c0_9] : memref<16x8xf32, #tpu.memory_space<vmem>>, vector<16x8xf32>
    %19 = arith.mulf %18, %17 : vector<16x8xf32>
    %20 = arith.addf %6, %19 : vector<16x8xf32>
    %21 = tpu.iota {dimensions = array<i32: 1>} : vector<16x8xi32>
    %22 = tpu.iota {dimensions = array<i32: 1>} : vector<16x2xi32>
    %false = arith.constant false
    %23 = vector.broadcast %false : i1 to vector<16x8xi1>
    %c0_i32 = arith.constant 0 : i32
    %24 = vector.broadcast %c0_i32 : i32 to vector<16x2xi32>
    %cst_10 = arith.constant dense<0xFF800000> : vector<16xf32>
    %25 = vector.multi_reduction <maximumf>, %20, %cst_10 [1] : vector<16x8xf32> to vector<16xf32>
    %26 = vector.shape_cast %25 : vector<16xf32> to vector<16x1xf32>
    %27 = vector.broadcast %26 : vector<16x1xf32> to vector<16x8xf32>
    %28 = arith.cmpf oeq, %20, %27 : vector<16x8xf32>
    %c8_i32 = arith.constant 8 : i32
    %29 = vector.broadcast %c8_i32 : i32 to vector<16x8xi32>
    %30 = arith.select %28, %21, %29 : vector<16x8xi1>, vector<16x8xi32>
    %cst_11 = arith.constant dense<2147483647> : vector<16xi32>
    %31 = vector.multi_reduction <minsi>, %30, %cst_11 [1] : vector<16x8xi32> to vector<16xi32>
    %32 = vector.shape_cast %31 : vector<16xi32> to vector<16x1xi32>
    %33 = vector.broadcast %32 : vector<16x1xi32> to vector<16x8xi32>
    %34 = arith.cmpi eq, %21, %33 : vector<16x8xi32>
    %35 = arith.ori %23, %34 : vector<16x8xi1>
    %c0_i32_12 = arith.constant 0 : i32
    %36 = vector.broadcast %c0_i32_12 : i32 to vector<16x2xi32>
    %37 = arith.cmpi eq, %22, %36 : vector<16x2xi32>
    %38 = vector.shape_cast %32 : vector<16x1xi32> to vector<16x1xi32>
    %39 = vector.broadcast %38 : vector<16x1xi32> to vector<16x2xi32>
    %40 = arith.select %37, %39, %24 : vector<16x2xi1>, vector<16x2xi32>
    %cst_13 = arith.constant 0xFF800000 : f32
    %41 = vector.broadcast %cst_13 : f32 to vector<16x8xf32>
    %42 = arith.select %34, %41, %20 : vector<16x8xi1>, vector<16x8xf32>
    %cst_14 = arith.constant dense<0xFF800000> : vector<16xf32>
    %43 = vector.multi_reduction <maximumf>, %42, %cst_14 [1] : vector<16x8xf32> to vector<16xf32>
    %44 = vector.shape_cast %43 : vector<16xf32> to vector<16x1xf32>
    %45 = vector.broadcast %44 : vector<16x1xf32> to vector<16x8xf32>
    %46 = arith.cmpf oeq, %42, %45 : vector<16x8xf32>
    %c8_i32_15 = arith.constant 8 : i32
    %47 = vector.broadcast %c8_i32_15 : i32 to vector<16x8xi32>
    %48 = arith.select %46, %21, %47 : vector<16x8xi1>, vector<16x8xi32>
    %cst_16 = arith.constant dense<2147483647> : vector<16xi32>
    %49 = vector.multi_reduction <minsi>, %48, %cst_16 [1] : vector<16x8xi32> to vector<16xi32>
    %50 = vector.shape_cast %49 : vector<16xi32> to vector<16x1xi32>
    %51 = vector.broadcast %50 : vector<16x1xi32> to vector<16x8xi32>
    %52 = arith.cmpi eq, %21, %51 : vector<16x8xi32>
    %53 = arith.ori %35, %52 : vector<16x8xi1>
    %c1_i32 = arith.constant 1 : i32
    %54 = vector.broadcast %c1_i32 : i32 to vector<16x2xi32>
    %55 = arith.cmpi eq, %22, %54 : vector<16x2xi32>
    %56 = vector.shape_cast %50 : vector<16x1xi32> to vector<16x1xi32>
    %57 = vector.broadcast %56 : vector<16x1xi32> to vector<16x2xi32>
    %58 = arith.select %55, %57, %40 : vector<16x2xi1>, vector<16x2xi32>
    %59 = vector.broadcast %26 : vector<16x1xf32> to vector<16x8xf32>
    %60 = arith.subf %20, %59 : vector<16x8xf32>
    %61 = math.exp %60 : vector<16x8xf32>
    %cst_17 = arith.constant 0.000000e+00 : f32
    %62 = vector.broadcast %cst_17 : f32 to vector<16x8xf32>
    %63 = arith.select %53, %61, %62 : vector<16x8xi1>, vector<16x8xf32>
    %cst_18 = arith.constant dense<0.000000e+00> : vector<16xf32>
    %64 = vector.multi_reduction <add>, %63, %cst_18 [1] : vector<16x8xf32> to vector<16xf32>
    %65 = vector.shape_cast %64 : vector<16xf32> to vector<16x1xf32>
    %66 = vector.broadcast %65 : vector<16x1xf32> to vector<16x8xf32>
    %67 = arith.divf %63, %66 : vector<16x8xf32>
    %c0_19 = arith.constant 0 : index
    %c0_20 = arith.constant 0 : index
    %68 = vector.load %arg5[%c0_19, %c0_20] : memref<16x8xf32, #tpu.memory_space<vmem>>, vector<16x8xf32>
    tpu.vector_store %arg5[%c0_19, %c0_20], %67 {strides = array<i32>} : memref<16x8xf32, #tpu.memory_space<vmem>>, vector<16x8xf32>,
    %c0_21 = arith.constant 0 : index
    %c0_22 = arith.constant 0 : index
    %69 = vector.load %arg6[%c0_21, %c0_22] : memref<16x2xi32, #tpu.memory_space<vmem>>, vector<16x2xi32>
    tpu.vector_store %arg6[%c0_21, %c0_22], %58 {strides = array<i32>} : memref<16x2xi32, #tpu.memory_space<vmem>>, vector<16x2xi32>,
    return
  }
  func.func @transform_0(%arg0: i32) -> (i32, i32) {
    %c0_i32 = arith.constant 0 : i32
    %c0_i32_0 = arith.constant 0 : i32
    return %arg0, %c0_i32 : i32, i32
  }
  func.func @transform_1(%arg0: i32) -> (i32, i32) {
    %c0_i32 = arith.constant 0 : i32
    %c0_i32_0 = arith.constant 0 : i32
    %c0_i32_1 = arith.constant 0 : i32
    return %c0_i32, %c0_i32_0 : i32, i32
  }
  func.func @transform_2(%arg0: i32) -> (i32, i32) {
    %c0_i32 = arith.constant 0 : i32
    %c0_i32_0 = arith.constant 0 : i32
    %c0_i32_1 = arith.constant 0 : i32
    return %c0_i32, %c0_i32_0 : i32, i32
  }
  func.func @transform_3(%arg0: i32) -> (i32, i32) {
    %c0_i32 = arith.constant 0 : i32
    %c0_i32_0 = arith.constant 0 : i32
    return %arg0, %c0_i32 : i32, i32
  }
  func.func @transform_4(%arg0: i32) -> (i32, i32) {
    %c0_i32 = arith.constant 0 : i32
    %c0_i32_0 = arith.constant 0 : i32
    return %arg0, %c0_i32 : i32, i32
  }
  func.func @transform_5(%arg0: i32) -> (i32, i32) {
    %c0_i32 = arith.constant 0 : i32
    %c0_i32_0 = arith.constant 0 : i32
    return %arg0, %c0_i32 : i32, i32
  }
}

</mosaic_0001>

<bundles_post_ra>
// kernel: tpu_custom_call.1
= control target key start
LH: loop header
LB: loop body
LE: loop exit
PB: predicated region body
PF: predicated region fallthrough
CT: control target
= control target key end

     0   :  { %vm32_vm0 = vcmask 261120   ;;  %vm148_vm1 = vcmask 64512   ;;  %v146_v39 = vlaneseq  ;;  %vm263_vm14 = vcmask 15360   ;;  %s457_s1 = inlined_call_operand.vmem [shape: f32[32,16], index: 1, kind: input, shape index: {}]   ;;  %s458_s0 = inlined_call_operand.vmem [shape: f32[16,32], index: 0, kind: input, shape index: {}]   ;;  %s459_s2 = inlined_call_operand.vmem [shape: f32[1,16], index: 2, kind: input, shape index: {}]   ;;  %s460_s3 = inlined_call_operand.vmem [shape: f32[16,8], index: 3, kind: input, shape index: {}]   ;;  %s461_s5 = inlined_call_operand.vmem [shape: s32[16,2], index: 5, kind: output, shape index: {1}]   ;;  %s462_s4 = inlined_call_operand.vmem [shape: f32[16,8], index: 4, kind: output, shape index: {0}]  }
   0x1   :  { %v24_v0 = vld [vmem:[%s457_s1 + $0x18] sm:$0xff]  ;;  %v23_v1 = vld [vmem:[%s457_s1 + $0x10] sm:$0xff]  ;;  %v19_v2 = vld [vmem:[%s458_s0] sm:$0xff] }
   0x2   :  { %283 = vmatprep.subr.mxu0 %v24_v0  ;;  %v22_v3 = vld [vmem:[%s457_s1 + $0x8] sm:$0xff]  ;;  %291 = vmatprep.mubr.msk.f32.mxu0 %vm32_vm0, %v19_v2  ;;  %v21_v4 = vld [vmem:[%s457_s1] sm:$0xff]  ;;  %v379_v40 = vand.u32 127, %v146_v39 }
   0x3   :  { %284 = vmatpush3.msra.mxu0 %v24_v0  ;;  %v20_v5 = vld [vmem:[%s458_s0 + $0x8] sm:$0xff]  ;;  %v274_v6 = vld [vmem:[%s459_s2] ss:$0 sm:$0xff]  ;;  %s311_s0 = smov 120  }
   0x4   :  { %285 = vmatprep.subr.mxu0 %v23_v1  ;;  %v132_v29 = vld [vmem:[%s460_s3] sm:$0xff]  ;;  %v133_v32 = vld [vmem:[%s460_s3 + $0x8] sm:$0xff]  ;;  %vm191_vm12 = vcmp.eq.s32.totalorder %v379_v40, 0  ;;  %vm240_vm13 = vcmp.eq.s32.totalorder %v379_v40, 1 }
   0x5   :  { %286 = vmatpush3.msra.mxu0 %v23_v1 }
   0x6   :  { %287 = vmatprep.subr.mxu0 %v22_v3 }
   0x7   :  { %288 = vmatpush3.msra.mxu0 %v22_v3 }
   0x8   :  { %289 = vmatprep.subr.mxu0 %v21_v4 }
   0x9   :  { %290 = vmatpush3.msra.mxu0 %v21_v4 }
   0xa   :  { %292 = vmatmul.mubr.msk.f32.vlgmr.msra.gmra.mxu0 %vm32_vm0, %v20_v5 }
  0xca   :  { %v293_v7 = vpop.f32.mrf.mxu0 }
  0xcb   :  { %v111_v8 = vadd.f32 %v293_v7, %v274_v6 }
  0xcc   :  { %v105_v9 = vpop.f32.mrf.mxu0 }
  0xcd   :  { %v117_v10 = vand.u32 2147483647, %v111_v8  ;;  %v106_v11 = vadd.f32 %v274_v6, %v105_v9  ;;  %v115_v27 = vmax.f32 %v111_v8, 0.0 }
  0xcf   :  { %v119_v12 = vsub.f32 0.0, %v117_v10  ;;  %v116_v13 = vand.u32 2147483647, %v106_v11  ;;  %v114_v23 = vmax.f32 %v106_v11, 0.0 }
  0xd1   :  { %v122_v14 = vmul.f32 1.442695, %v119_v12  ;;  %v118_v15 = vsub.f32 0.0, %v116_v13 }
  0xd3   :  { %295 = vpow2.f32 %v122_v14  ;;  %v120_v16 = vmul.f32 1.442695, %v118_v15 }
  0xd5   :  { %297 = vpow2.f32 %v120_v16 }
  0xe0   :  { %v296_v17 = vpop.eup %295 }
  0xe1   :  { %v125_v18 = vadd.f32 1.0, %v296_v17 }
  0xe2   :  { %v298_v19 = vpop.eup %297 }
  0xe3   :  { %v124_v20 = vadd.f32 1.0, %v298_v19  ;;  %299 = vlog2.f32 %v125_v18 }
  0xe5   :  { %301 = vlog2.f32 %v124_v20 }
  0xf0   :  { %v300_v21 = vpop.eup %299 }
  0xf1   :  { %v129_v26 = vmul.f32 0.6931472, %v300_v21 }
  0xf2   :  { %v302_v22 = vpop.eup %301 }
  0xf3   :  { %v127_v24 = vmul.f32 0.6931472, %v302_v22  ;;  %v131_v28 = vadd.f32 %v129_v26, %v115_v27 }
  0xf5   :  { %v130_v25 = vadd.f32 %v127_v24, %v114_v23 }
  0xf7   :  { %136 = vrot.lane.b32.xlu0 %v130_v25, %s311_s0 }
  0xfb   :  { %138 = vrot.lane.b32.xlu0 %v131_v28, %s311_s0 }
 0x169   :  { %v137_v30 = vpop.permute.xlu0 %136 }
 0x16a   :  { %v142_v31 = vmul.f32 %v137_v30, %v132_v29 }
 0x16c   :  { %v371_v33 = vadd.f32 %v142_v31, %v106_v11 }
 0x16d   :  { %v139_v34 = vpop.permute.xlu0 %138 }
 0x16e   :  { %v143_v35 = vmul.f32 %v139_v34, %v133_v32  ;;  %v149_v36 = vsel %vm148_vm1, %v371_v33, -inf }
 0x16f   :  { %150 = vmax.xlane.f32.xlu1 %v149_v36 }
 0x170   :  { %v375_v37 = vadd.f32 %v143_v35, %v111_v8 }
 0x172   :  { %v152_v38 = vsel %vm148_vm1, %v375_v37, -inf }
 0x173   :  { %153 = vmax.xlane.f32.xlu1 %v152_v38 }
 0x1f8   :  { %v381_v41 = vpop.xlane.xlu1 %150 }
 0x1f9   :  { %vm155_vm2 = vcmp.eq.f32.partialorder %v371_v33, %v381_v41  ;;  %v243_v27 = vsub.f32 %v371_v33, %v381_v41 }
 0x1fa   :  { %v157_v42 = vsel %vm155_vm2, %v379_v40, 8 }
 0x1fb   :  { %v159_v43 = vsel %vm148_vm1, %v157_v42, 2147483647  ;;  %v245_v28 = vmul.f32 1.442695, %v243_v27 }
 0x1fc   :  { %v387_v44 = vpop.xlane.xlu1 %153  ;;  %v161_v45 = vshra.s32 %v159_v43, 16  ;;  %v160_v51 = vand.u32 65535, %v159_v43 }
 0x1fd   :  { %vm156_vm3 = vcmp.eq.f32.partialorder %v375_v37, %v387_v44  ;;  %v244_v29 = vsub.f32 %v375_v37, %v387_v44  ;;  %303 = vpow2.f32 %v245_v28 }
 0x1fe   :  { %v158_v46 = vsel %vm156_vm3, %v379_v40, 8  ;;  %v163_v47 = vcvt.s32.f32 %v161_v45  ;;  %v162_v53 = vcvt.s32.f32 %v160_v51 }
 0x1ff   :  { %v174_v48 = vsel %vm148_vm1, %v158_v46, 2147483647  ;;  %v247_v30 = vmul.f32 1.442695, %v244_v29 }
 0x200   :  { %164 = vmin.xlane.f32.xlu0 %v163_v47  ;;  %v176_v49 = vshra.s32 %v174_v48, 16  ;;  %v175_v54 = vand.u32 65535, %v174_v48 }
 0x201   :  { %305 = vpow2.f32 %v247_v30 }
 0x202   :  { %v178_v50 = vcvt.s32.f32 %v176_v49  ;;  %v177_v57 = vcvt.s32.f32 %v175_v54 }
 0x204   :  { %179 = vmin.xlane.f32.xlu1 %v178_v50 }
 0x20a   :  { %v304_v43 = vpop.eup %303 }
 0x20e   :  { %v306_v49 = vpop.eup %305 }
 0x289   :  { %v165_v52 = vpop.xlane.xlu0 %164 }
 0x28a   :  { %vm166_vm4 = vcmp.eq.f32.partialorder %v163_v47, %v165_v52  ;;  %v171_v59 = vcvt.f32.s32 %v165_v52 }
 0x28b   :  { %v167_v55 = vsel %vm166_vm4, %v162_v53, inf }
 0x28c   :  { %168 = vmin.xlane.f32.xlu1 %v167_v55  ;;  %v172_v61 = vshll.u32 %v171_v59, 16 }
 0x28d   :  { %v180_v56 = vpop.xlane.xlu1 %179 }
 0x28e   :  { %vm181_vm5 = vcmp.eq.f32.partialorder %v178_v50, %v180_v56  ;;  %v186_v62 = vcvt.f32.s32 %v180_v56 }
 0x28f   :  { %v182_v58 = vsel %vm181_vm5, %v177_v57, inf }
 0x290   :  { %183 = vmin.xlane.f32.xlu1 %v182_v58  ;;  %v187_v2 = vshll.u32 %v186_v62, 16 }
 0x315   :  { %v169_v60 = vpop.xlane.xlu1 %168 }
 0x316   :  { %v170_v63 = vcvt.f32.s32 %v169_v60 }
 0x318   :  { %v393_v0 = vadd.s32 %v172_v61, %v170_v63 }
 0x319   :  { %v184_v1 = vpop.xlane.xlu1 %183 }
 0x31a   :  { %v185_v3 = vcvt.f32.s32 %v184_v1  ;;  %vm189_vm6 = vcmp.eq.s32.totalorder %v379_v40, %v393_v0 }
 0x31b   :  { %v194_v4 = vsel %vm189_vm6, -inf, %v371_v33  ;;  %v192_v33 = vsel %vm191_vm12, %v393_v0, 0 }
 0x31c   :  { %v401_v5 = vadd.s32 %v187_v2, %v185_v3  ;;  %v196_v6 = vsel %vm148_vm1, %v194_v4, -inf }
 0x31d   :  { %197 = vmax.xlane.f32.xlu1 %v196_v6 }
 0x31e   :  { %vm190_vm7 = vcmp.eq.s32.totalorder %v379_v40, %v401_v5  ;;  %v193_v46 = vsel %vm191_vm12, %v401_v5, 0 }
 0x31f   :  { %v195_v7 = vsel %vm190_vm7, -inf, %v375_v37 }
 0x320   :  { %v199_v8 = vsel %vm148_vm1, %v195_v7, -inf }
 0x321   :  { %200 = vmax.xlane.f32.xlu1 %v199_v8 }
 0x3a6   :  { %v198_v9 = vpop.xlane.xlu1 %197 }
 0x3a7   :  { %vm202_vm8 = vcmp.eq.f32.partialorder %v194_v4, %v198_v9 }
 0x3a8   :  { %v204_v10 = vsel %vm202_vm8, %v379_v40, 8 }
 0x3a9   :  { %v206_v11 = vsel %vm148_vm1, %v204_v10, 2147483647 }
 0x3aa   :  { %v201_v12 = vpop.xlane.xlu1 %200  ;;  %v208_v13 = vshra.s32 %v206_v11, 16  ;;  %v207_v19 = vand.u32 65535, %v206_v11 }
 0x3ab   :  { %vm203_vm9 = vcmp.eq.f32.partialorder %v195_v7, %v201_v12 }
 0x3ac   :  { %v205_v14 = vsel %vm203_vm9, %v379_v40, 8  ;;  %v210_v15 = vcvt.s32.f32 %v208_v13  ;;  %v209_v21 = vcvt.s32.f32 %v207_v19 }
 0x3ad   :  { %v221_v16 = vsel %vm148_vm1, %v205_v14, 2147483647 }
 0x3ae   :  { %211 = vmin.xlane.f32.xlu1 %v210_v15  ;;  %v223_v17 = vshra.s32 %v221_v16, 16  ;;  %v222_v22 = vand.u32 65535, %v221_v16 }
 0x3b0   :  { %v225_v18 = vcvt.s32.f32 %v223_v17  ;;  %v224_v25 = vcvt.s32.f32 %v222_v22 }
 0x3b2   :  { %226 = vmin.xlane.f32.xlu1 %v225_v18 }
 0x437   :  { %v212_v20 = vpop.xlane.xlu1 %211 }
 0x438   :  { %vm213_vm10 = vcmp.eq.f32.partialorder %v210_v15, %v212_v20  ;;  %v218_v31 = vcvt.f32.s32 %v212_v20 }
 0x439   :  { %v214_v23 = vsel %vm213_vm10, %v209_v21, inf }
 0x43a   :  { %215 = vmin.xlane.f32.xlu1 %v214_v23  ;;  %v219_v34 = vshll.u32 %v218_v31, 16 }
 0x43b   :  { %v227_v24 = vpop.xlane.xlu1 %226 }
 0x43c   :  { %vm228_vm11 = vcmp.eq.f32.partialorder %v225_v18, %v227_v24  ;;  %v233_v35 = vcvt.f32.s32 %v227_v24 }
 0x43d   :  { %v229_v26 = vsel %vm228_vm11, %v224_v25, inf }
 0x43e   :  { %230 = vmin.xlane.f32.xlu0 %v229_v26  ;;  %v234_v37 = vshll.u32 %v233_v35, 16 }
 0x4c3   :  { %v216_v32 = vpop.xlane.xlu1 %215 }
 0x4c4   :  { %v217_v36 = vcvt.f32.s32 %v216_v32 }
 0x4c6   :  { %v220_v38 = vadd.s32 %v219_v34, %v217_v36 }
 0x4c7   :  { %v231_v39 = vpop.xlane.xlu0 %230 }
 0x4c8   :  { %v241_v41 = vsel %vm240_vm13, %v220_v38, %v192_v33  ;;  %v232_v42 = vcvt.f32.s32 %v231_v39  ;;  %vm236_vm15 = vcmp.eq.s32.totalorder %v379_v40, %v220_v38 }
 0x4c9   :  { %264 = vst.msk [vmem:[%s461_s5] sm:$0xff] %vm263_vm14, %v241_v41  ;;  %vm238_vm0 = vmor %vm189_vm6, %vm236_vm15 }
 0x4ca   :  { %v235_v44 = vadd.s32 %v234_v37, %v232_v42  ;;  %v249_v45 = vsel %vm238_vm0, %v304_v43, 0.0 }
 0x4cb   :  { %v251_v47 = vsel %vm148_vm1, %v249_v45, 0.0 }
 0x4cc   :  { %v242_v48 = vsel %vm240_vm13, %v235_v44, %v193_v46  ;;  %252 = vadd.xlane.f32.xlu1 %v251_v47  ;;  %vm237_vm2 = vcmp.eq.s32.totalorder %v379_v40, %v235_v44 }
 0x4cd   :  { %265 = vst.msk [vmem:[%s461_s5 + $0x8] sm:$0xff] %vm263_vm14, %v242_v48  ;;  %vm239_vm3 = vmor %vm190_vm7, %vm237_vm2 }
 0x4ce   :  { %v250_v50 = vsel %vm239_vm3, %v306_v49, 0.0 }
 0x4cf   :  { %v254_v51 = vsel %vm148_vm1, %v250_v50, 0.0 }
 0x4d0   :  { %255 = vadd.xlane.f32.xlu0 %v254_v51 }
 0x555   :  { %v253_v52 = vpop.xlane.xlu1 %252 }
 0x556   :  { %307 = vrcp.f32 %v253_v52 }
 0x559   :  { %v256_v53 = vpop.xlane.xlu0 %255 }
 0x55a   :  { %309 = vrcp.f32 %v256_v53 }
 0x563   :  { %v308_v54 = vpop.eup %307 }
 0x564   :  { %v258_v55 = vmul.f32 %v308_v54, %v249_v45 }
 0x566   :  { %261 = vst.msk [vmem:[%s462_s4] sm:$0xff] %vm148_vm1, %v258_v55 }
 0x567   :  { %v310_v56 = vpop.eup %309 }
 0x568   :  { %v260_v57 = vmul.f32 %v310_v56, %v250_v50 }
 0x56a   :  { %262 = vst.msk [vmem:[%s462_s4 + $0x8] sm:$0xff] %vm148_vm1, %v260_v57 }

</bundles_post_ra>
